<compile_context>
chip_gen: v7x
topology: tpu7x:2x2x1
jax: 0.10.0
libtpu: 0.0.40
codegen_flags: <defaults>
</compile_context>

<pallas_src>
import jax
import jax.numpy as jnp
import numpy as np
from jax.experimental import pallas as pl
from jax.experimental.pallas import tpu as pltpu


def _round_up(x, m):
    return ((x + m - 1) // m) * m


def _choose_row_tile(n, tm_req):
    """Row tile: tm_req for large N, else N rounded up to a multiple of 16."""
    if n >= tm_req:
        return tm_req
    return max(16, _round_up(n, 16))


def _choose_col_tile(c, tc_req):
    """Largest multiple of 128 <= tc_req dividing c (falls back to full c)."""
    tc_req = min(tc_req, c)
    if c % tc_req == 0:
        return tc_req
    best = None
    t = 128
    while t <= tc_req:
        if c % t == 0:
            best = t
        t += 128
    return best if best is not None else c


def _vmem_limit(nbytes):
    # Explicit scoped-VMEM limit: actual footprint + headroom, >= 32 MiB.
    return int(min(128 << 20, max(32 << 20, int(nbytes * 1.25) + (4 << 20))))


# ---------------------------------------------------------------------------
# Kernel A: hidden projection h = tanh(x @ W1 + b1), tiled over rows and
# output columns.  Both grid axes are fully parallel (no accumulation).
# ---------------------------------------------------------------------------
def hidden_proj_kernel(x_ref, w1_ref, b1_ref, h_ref):
    # x_ref: (tm, H) bf16   w1_ref: (H, th) bf16   b1_ref: (1, th) f32
    # h_ref: (tm, th) bf16
    h = jnp.tanh(
        jnp.dot(x_ref[...], w1_ref[...], preferred_element_type=jnp.float32)
        + b1_ref[...]
    )
    h_ref[...] = h.astype(h_ref.dtype)


def hidden_projection(x_p, w1, b1, *, tm, th_req=512):
    """x_p: [n_pad, H] bf16 -> h: [n_pad, H_out] bf16."""
    n_pad, H = x_p.shape
    H_out = w1.shape[1]
    th = _choose_col_tile(H_out, th_req)

    w1_b = w1.astype(jnp.bfloat16)
    b1_f = b1.reshape(1, H_out).astype(jnp.float32)

    # Double-buffered footprint (lane/sublane padding approximated).
    need = (2 * tm * H * 2) + (2 * H * th * 2) + (2 * max(th, 128) * 8 * 4) \
           + (2 * tm * th * 2)

    return pl.pallas_call(
        hidden_proj_kernel,
        out_shape=jax.ShapeDtypeStruct((n_pad, H_out), jnp.bfloat16),
        grid_spec=pltpu.PrefetchScalarGridSpec(
            num_scalar_prefetch=0,
            grid=(n_pad // tm, H_out // th),
            in_specs=[
                pl.BlockSpec((tm, H), lambda i, j: (i, 0)),    # x rows
                pl.BlockSpec((H, th), lambda i, j: (0, j)),    # W1 column slab
                pl.BlockSpec((1, th), lambda i, j: (0, j)),    # b1 slab
            ],
            out_specs=pl.BlockSpec((tm, th), lambda i, j: (i, j)),
        ),
        compiler_params=pltpu.CompilerParams(
            dimension_semantics=("parallel", "parallel"),
            vmem_limit_bytes=_vmem_limit(need),
        ),
    )(x_p, w1_b, b1_f)


# ---------------------------------------------------------------------------
# Kernel B: fused lm_head matmul, online logsumexp and target-logit gather.
#
#   out[r] = logits[r, tgt[r]] - logsumexp_v(logits[r, :])
# where logits = h @ W2 + b2, streamed over vocab tiles (innermost axis).
#
# NOTE: the init-at-j==0 / finalize-at-j==nj-1 accumulator scheme requires the
# vocab axis to stay innermost and sequential ("arbitrary").
# ---------------------------------------------------------------------------
def fused_lm_head_log_probs_kernel(
    h_ref, w2_ref, b2_ref, tgt_ref, out_ref, m_sc, l_sc, t_sc
):
    # h_ref:  (tm, H) bf16   w2_ref: (H, tv) bf16   b2_ref: (1, tv) f32
    # tgt_ref: (tm, 1) i32   out_ref: (tm, 1) f32
    # m_sc/l_sc/t_sc: (tm, 1) f32
    j = pl.program_id(1)
    nj = pl.num_programs(1)
    tv = w2_ref.shape[1]

    @pl.when(j == 0)
    def _():
        m_sc[...] = jnp.full_like(m_sc, -jnp.inf)
        l_sc[...] = jnp.zeros_like(l_sc)
        t_sc[...] = jnp.zeros_like(t_sc)

    # Vocab-tile logits, f32 accumulation on the MXU.
    logits = (
        jnp.dot(h_ref[...], w2_ref[...], preferred_element_type=jnp.float32)
        + b2_ref[...]
    )  # (tm, tv) f32

    # Online logsumexp: single exp pass per tile.
    m_new = jnp.maximum(m_sc[...], jnp.max(logits, axis=-1, keepdims=True))
    alpha = jnp.exp(m_sc[...] - m_new)
    p = jnp.exp(logits - m_new)
    l_sc[...] = alpha * l_sc[...] + jnp.sum(p, axis=-1, keepdims=True)
    m_sc[...] = m_new

    # Target-logit gather: shift the (tm,1) target column by j*tv instead of
    # adding j*tv to the full (tm,tv) iota (cheaper VALU per step).  The
    # one-hot hits exactly once across all vocab tiles, so a running sum is
    # exact.
    local_ids = jax.lax.broadcasted_iota(jnp.int32, logits.shape, 1)
    onehot = local_ids == (tgt_ref[...] - j * tv)
    t_sc[...] += jnp.sum(jnp.where(onehot, logits, 0.0), axis=-1, keepdims=True)

    @pl.when(j == nj - 1)
    def _():
        out_ref[...] = t_sc[...] - (m_sc[...] + jnp.log(l_sc[...]))


def fused_lm_head_log_probs(x, w1, b1, w2, b2, targets, *, tm=512, tv=1024):
    """x: [N, H] f32, targets: [N] int32 -> token log-probs [N] f32."""
    N, H = x.shape
    V = w2.shape[1]
    tv = _choose_col_tile(V, tv)

    # Row tiling (pad rows to a multiple of tm; padded rows are discarded).
    tm = _choose_row_tile(N, tm)
    n_pad = _round_up(N, tm)
    grid_rows = n_pad // tm

    x_p = jnp.zeros((n_pad, H), jnp.bfloat16).at[:N].set(x.astype(jnp.bfloat16))
    t_p = jnp.zeros((n_pad, 1), jnp.int32).at[:N, 0].set(targets.astype(jnp.int32))

    # Stage 1: hidden projection (own kernel; keeps W1 out of the vocab loop).
    h = hidden_projection(x_p, w1, b1, tm=tm)          # [n_pad, H2] bf16
    H2 = h.shape[1]

    w2_b = w2.astype(jnp.bfloat16)
    b2_f = b2.reshape(1, V).astype(jnp.float32)

    # Double-buffered footprint estimate (lane padding of narrow cols approx'd).
    need = (2 * tm * H2 * 2) + (2 * H2 * tv * 2) + (2 * max(tv, 128) * 8 * 4) \
           + (2 * tm * 128 * 4) + (2 * tm * 128 * 4) + (3 * tm * 128 * 4)

    out = pl.pallas_call(
        fused_lm_head_log_probs_kernel,
        out_shape=jax.ShapeDtypeStruct((n_pad, 1), jnp.float32),
        grid_spec=pltpu.PrefetchScalarGridSpec(
            num_scalar_prefetch=0,
            grid=(grid_rows, V // tv),           # vocab (reuse) axis innermost
            in_specs=[
                pl.BlockSpec((tm, H2), lambda i, j: (i, 0)),   # h rows
                pl.BlockSpec((H2, tv), lambda i, j: (0, j)),   # W2 vocab slab
                pl.BlockSpec((1, tv), lambda i, j: (0, j)),    # b2 vocab slab
                pl.BlockSpec((tm, 1), lambda i, j: (i, 0)),    # targets
            ],
            out_specs=pl.BlockSpec((tm, 1), lambda i, j: (i, 0)),
            scratch_shapes=[
                pltpu.VMEM((tm, 1), jnp.float32),    # running max
                pltpu.VMEM((tm, 1), jnp.float32),    # running sum(exp)
                pltpu.VMEM((tm, 1), jnp.float32),    # target logit
            ],
        ),
        compiler_params=pltpu.CompilerParams(
            dimension_semantics=("parallel", "arbitrary"),
            vmem_limit_bytes=_vmem_limit(need),
        ),
    )(h, w2_b, b2_f, t_p)

    return out[:N, 0]


# ---------------------------------------------------------------------------
# Actor forward (JAX glue around the Pallas kernels)
# ---------------------------------------------------------------------------
def actor_forward(params, sequences, attention_mask, num_actions):
    B, T = sequences.shape
    H = params["tok_emb"].shape[1]

    # position_ids = attention_mask.cumsum(-1) - 1; masked_fill(mask==0, 1)
    am = attention_mask.astype(jnp.int32)
    position_ids = jnp.cumsum(am, axis=-1) - 1
    position_ids = jnp.where(am == 0, 1, position_ids)

    # embedding lookups (glue)
    tok = jnp.take(params["tok_emb"], sequences, axis=0)       # [B, T, H]
    pos = jnp.take(params["pos_emb"], position_ids, axis=0)    # [B, T, H]
    x = (tok + pos).astype(jnp.float32)                        # [B, T, H]

    # logits[:, :-1, :] depend only on x[:, :-1, :] for this per-token head,
    # so slice before the kernels: never compute/materialize the last position.
    x_in = x[:, :-1, :].reshape(B * (T - 1), H)
    targets = sequences[:, 1:].reshape(B * (T - 1)).astype(jnp.int32)

    log_probs = fused_lm_head_log_probs(
        x_in, params["w1"], params["b1"], params["w2"], params["b2"], targets
    ).reshape(B, T - 1)

    # action_log_probs = log_probs[:, -num_actions:]
    return log_probs[:, -num_actions:]


# ---------------------------------------------------------------------------
# Pure-JAX reference for the correctness check
# ---------------------------------------------------------------------------
def actor_forward_ref(params, sequences, attention_mask, num_actions):
    B, T = sequences.shape
    am = attention_mask.astype(jnp.int32)
    position_ids = jnp.cumsum(am, axis=-1) - 1
    position_ids = jnp.where(am == 0, 1, position_ids)
    tok = jnp.take(params["tok_emb"], sequences, axis=0)
    pos = jnp.take(params["pos_emb"], position_ids, axis=0)
    x = (tok + pos).reshape(B * T, -1).astype(jnp.float32)
    h = jnp.tanh(x @ params["w1"] + params["b1"])
    logits = (h @ params["w2"] + params["b2"]).reshape(B, T, -1)
    lsm = jax.nn.log_softmax(logits[:, :-1, :], axis=-1)
    lp = jnp.take_along_axis(lsm, sequences[:, 1:, None], axis=-1)[..., 0]
    return lp[:, -num_actions:]


if __name__ == "__main__":
    B, T, H, V = 2, 8, 128, 256
    num_actions = 4

    key = jax.random.PRNGKey(0)
    k_seq, k_tok, k_pos, k_w1, k_w2 = jax.random.split(key, 5)

    sequences = jax.random.randint(k_seq, (B, T), 0, V, dtype=jnp.int32)
    # attention mask: seq0 fully valid, seq1 has 2 trailing pads
    attention_mask = jnp.array(
        [[1] * T, [1] * (T - 2) + [0, 0]], dtype=jnp.int32
    )

    params = {
        "tok_emb": 0.05 * jax.random.normal(k_tok, (V, H), jnp.float32),
        "pos_emb": 0.05 * jax.random.normal(k_pos, (T + 1, H), jnp.float32),
        "w1": 0.05 * jax.random.normal(k_w1, (H, H), jnp.float32),
        "b1": jnp.zeros((1, H), jnp.float32),
        "w2": 0.05 * jax.random.normal(k_w2, (H, V), jnp.float32),
        "b2": jnp.zeros((1, V), jnp.float32),
    }

    action_log_probs = jax.block_until_ready(
        actor_forward(params, sequences, attention_mask, num_actions)
    )
    ref = jax.block_until_ready(
        actor_forward_ref(params, sequences, attention_mask, num_actions)
    )

    assert action_log_probs.shape == (B, num_actions)
    np.testing.assert_allclose(
        np.asarray(action_log_probs), np.asarray(ref), rtol=2e-2, atol=2e-2
    )
    print("KERNEL_OK")
</pallas_src>

<mosaic_0001>
module attributes {stable_mosaic.version = 11 : i64} {
  func.func @hidden_proj_kernel(%arg0: i32, %arg1: i32, %arg2: memref<16x128xbf16, #tpu.memory_space<vmem>>, %arg3: memref<128x128xbf16, #tpu.memory_space<vmem>>, %arg4: memref<1x128xf32, #tpu.memory_space<vmem>>, %arg5: memref<16x128xbf16, #tpu.memory_space<vmem>>) attributes {dimension_semantics = [#tpu.dimension_semantics<parallel>, #tpu.dimension_semantics<parallel>], iteration_bounds = array<i64: 1, 1>, scalar_prefetch = 0 : i64, scratch_operands = 0 : i64, tpu.core_type = #tpu.core_type<tc>, window_params = [{transform_indices = @transform_0, window_bounds = array<i64: 16, 128>}, {transform_indices = @transform_1, window_bounds = array<i64: 128, 128>}, {transform_indices = @transform_2, window_bounds = array<i64: 1, 128>}, {transform_indices = @transform_3, window_bounds = array<i64: 16, 128>}]} {
    %c0 = arith.constant 0 : index
    %c0_0 = arith.constant 0 : index
    %0 = vector.load %arg2[%c0, %c0_0] : memref<16x128xbf16, #tpu.memory_space<vmem>>, vector<16x128xbf16>
    %c0_1 = arith.constant 0 : index
    %c0_2 = arith.constant 0 : index
    %1 = vector.load %arg3[%c0_1, %c0_2] : memref<128x128xbf16, #tpu.memory_space<vmem>>, vector<128x128xbf16>
    %cst = arith.constant dense<0.000000e+00> : vector<16x128xf32>
    %2 = tpu.matmul %0, %1, %cst {dimension_numbers = #tpu.dot_dimension_numbers<[1], [0], [0], [1], [0, 0, 1, 1], [], []>} : vector<16x128xbf16>, vector<128x128xbf16>, vector<16x128xf32> -> vector<16x128xf32>
    %c0_3 = arith.constant 0 : index
    %c0_4 = arith.constant 0 : index
    %3 = vector.load %arg4[%c0_3, %c0_4] : memref<1x128xf32, #tpu.memory_space<vmem>>, vector<1x128xf32>
    %4 = vector.broadcast %3 : vector<1x128xf32> to vector<16x128xf32>
    %5 = arith.addf %2, %4 : vector<16x128xf32>
    %6 = math.tanh %5 : vector<16x128xf32>
    %7 = arith.truncf %6 : vector<16x128xf32> to vector<16x128xbf16>
    %c0_5 = arith.constant 0 : index
    %c0_6 = arith.constant 0 : index
    %8 = vector.load %arg5[%c0_5, %c0_6] : memref<16x128xbf16, #tpu.memory_space<vmem>>, vector<16x128xbf16>
    tpu.vector_store %arg5[%c0_5, %c0_6], %7 {strides = array<i32>} : memref<16x128xbf16, #tpu.memory_space<vmem>>, vector<16x128xbf16>,
    return
  }
  func.func @transform_0(%arg0: i32, %arg1: i32) -> (i32, i32) {
    %c0_i32 = arith.constant 0 : i32
    %c0_i32_0 = arith.constant 0 : i32
    return %arg0, %c0_i32 : i32, i32
  }
  func.func @transform_1(%arg0: i32, %arg1: i32) -> (i32, i32) {
    %c0_i32 = arith.constant 0 : i32
    %c0_i32_0 = arith.constant 0 : i32
    return %c0_i32, %arg1 : i32, i32
  }
  func.func @transform_2(%arg0: i32, %arg1: i32) -> (i32, i32) {
    %c0_i32 = arith.constant 0 : i32
    %c0_i32_0 = arith.constant 0 : i32
    return %c0_i32, %arg1 : i32, i32
  }
  func.func @transform_3(%arg0: i32, %arg1: i32) -> (i32, i32) {
    %c0_i32 = arith.constant 0 : i32
    return %arg0, %arg1 : i32, i32
  }
}

</mosaic_0001>

<bundles_post_ra>
// kernel: tpu_custom_call.1
= control target key start
LH: loop header
LB: loop body
LE: loop exit
PB: predicated region body
PF: predicated region fallthrough
CT: control target
= control target key end

     0   :  { %8 = vsyncpa [#allocation3], 0  ;;  %s409_s0 = inlined_call_operand.hbm [shape: bf16[16,128], index: 0, kind: input, shape index: {}]   ;;  %s410_s1 = inlined_call_operand.hbm [shape: bf16[128,128], index: 1, kind: input, shape index: {}]   ;;  %s411_s2 = inlined_call_operand.vmem [shape: f32[1,128], index: 2, kind: input, shape index: {}]   ;;  %s412_s3 = inlined_call_operand.hbm [shape: bf16[16,128], index: 3, kind: output, shape index: {}]  }
   0x1   :  { %9 = vsyncpa [#allocation6], 0 }
   0x2   :  { %10 = vsyncpa [#allocation4], 0  ;;  %s334_s12 = smov [#allocation2]   ;;  %s262_s16 = scalar_lea.hbm %s409_s0, 128 }
   0x3   :  { %s16_s13 = sshll.u32 %s334_s12, 4  ;;  %p263_p0 = scmp.ne.s32.totalorder %s409_s0, %s262_s16  ;;  %s17_s13 = int_to_ptr.vmem [resolvable:$true] %s16_s13 }
   0x4   :  { %p266_p1 = scmp.lt.u32.totalorder %s262_s16, %s409_s0 }
   0x6   :  { %p268_p2 = pnand %p266_p1, %p263_p0 }
   0x8   :  { %271 = shalt.err (!%p268_p2)
}
   0x9   :  { %s272_s21 = scalar_lea.vmem %s17_s13, 128  ;;  %p277_p4 = scmp.lt.s32.totalorder %s17_s13, %s17_s13 }
   0xa   :  { %p273_p3 = scmp.ne.s32.totalorder %s17_s13, %s272_s21  ;;  %p278_p5 = scmp.lt.s32.totalorder %s272_s21, %s272_s21 }
   0xc   :  { %p279_p6 = por %p278_p5, %p277_p4 }
   0xe   :  { %p280_p7 = pnand %p279_p6, %p273_p3 }
  0x10   :  { %283 = shalt.err (!%p280_p7)
}
  0x11   :  { %s335_s22 = smov 64   ;;  %s336_s23 = smov 4  }
  0x12   :  { %22 = dma.hbm_to_vmem [thread:$0]  %s409_s0, 128, %s17_s13, [#allocation3], %s335_s22, %s335_s22, %s336_s23  }
  0x13   :  { %s337_s26 = smov [#allocation5]   ;;  %s284_s30 = scalar_lea.hbm %s410_s1, 1024 }
  0x14   :  { %s28_s27 = sshll.u32 %s337_s26, 4  ;;  %p285_p8 = scmp.ne.s32.totalorder %s410_s1, %s284_s30  ;;  %s29_s27 = int_to_ptr.vmem [resolvable:$true] %s28_s27 }
  0x15   :  { %p288_p9 = scmp.lt.u32.totalorder %s284_s30, %s410_s1 }
  0x17   :  { %p290_p10 = pnand %p288_p9, %p285_p8 }
  0x19   :  { %293 = shalt.err (!%p290_p10)
}
  0x1a   :  { %s294_s8 = scalar_lea.vmem %s29_s27, 1024  ;;  %p299_p12 = scmp.lt.s32.totalorder %s29_s27, %s29_s27 }
  0x1b   :  { %p295_p11 = scmp.ne.s32.totalorder %s29_s27, %s294_s8  ;;  %p300_p13 = scmp.lt.s32.totalorder %s294_s8, %s294_s8 }
  0x1d   :  { %p301_p0 = por %p300_p13, %p299_p12 }
  0x1f   :  { %p302_p1 = pnand %p301_p0, %p295_p11 }
  0x21   :  { %305 = shalt.err (!%p302_p1)
}
  0x22   :  { %34 = dma.hbm_to_vmem [thread:$0]  %s410_s1, 1024, %s29_s27, [#allocation6], %s335_s22, %s335_s22, %s336_s23  }
  0x23   :  { %328 = dma.done.wait [#allocation3], 128  }
  0x24   :  { %329 = vsyncadd [#allocation3], 4294967168 }
  0x25   :  { %330 = dma.done.wait [#allocation6], 1024  }
  0x26   :  { %331 = vsyncadd [#allocation6], 4294966272  ;;  %v338_v0 = vmov 0.0   ;;  %vm339_vm0 = vmmov 0   ;;  %v249_v1 = vld [vmem:[#allocation5] sm:$0xff]   ;;  %v250_v2 = vld [vmem:[#allocation5 + $0x8] sm:$0xff]  }
  0x27   :  { %222 = vmatprep.subr.bf16.mxu0 %v338_v0  ;;  %238 = vmatprep.mubr.msk.bf16.mxu0 %vm339_vm0, %v338_v0  ;;  %v251_v3 = vld [vmem:[#allocation5 + $0x10] sm:$0xff]   ;;  %v252_v4 = vld [vmem:[#allocation5 + $0x18] sm:$0xff]   ;;  %v253_v5 = vld [vmem:[#allocation5 + $0x20] sm:$0xff]   ;;  %s340_s11 = smov [#allocation7]  }
  0x28   :  { %223 = vmatpush3.bf16.msra.mxu0 %v249_v1  ;;  %v254_v6 = vld [vmem:[#allocation5 + $0x28] sm:$0xff]   ;;  %v255_v7 = vld [vmem:[#allocation5 + $0x30] sm:$0xff]   ;;  %v256_v8 = vld [vmem:[#allocation5 + $0x38] sm:$0xff]   ;;  %s181_s12 = sshll.u32 %s340_s11, 4  ;;  %s182_s12 = int_to_ptr.vmem [resolvable:$true] %s181_s12 }
  0x29   :  { %224 = vmatprep.subr.bf16.mxu0 %v338_v0  ;;  %v257_v9 = vld [vmem:[#allocation2] sm:$0xff]   ;;  %s306_s13 = scalar_lea.vmem %s182_s12, 128  ;;  %p311_p3 = scmp.lt.s32.totalorder %s182_s12, %s182_s12 }
  0x2a   :  { %v194_v10 = vld [vmem:[%s411_s2] ss:$0 sm:$0xff]  ;;  %p307_p2 = scmp.ne.s32.totalorder %s182_s12, %s306_s13  ;;  %p312_p4 = scmp.lt.s32.totalorder %s306_s13, %s306_s13 }
  0x2c   :  { %225 = vmatpush3.bf16.msra.mxu0 %v250_v2  ;;  %p313_p5 = por %p312_p4, %p311_p3 }
  0x2d   :  { %226 = vmatprep.subr.bf16.mxu0 %v338_v0 }
  0x2e   :  { %p314_p6 = pnand %p313_p5, %p307_p2 }
  0x30   :  { %227 = vmatpush3.bf16.msra.mxu0 %v251_v3 }
  0x31   :  { %228 = vmatprep.subr.bf16.mxu0 %v338_v0 }
  0x34   :  { %229 = vmatpush3.bf16.msra.mxu0 %v252_v4 }
  0x35   :  { %230 = vmatprep.subr.bf16.mxu0 %v338_v0 }
  0x38   :  { %231 = vmatpush3.bf16.msra.mxu0 %v253_v5 }
  0x39   :  { %232 = vmatprep.subr.bf16.mxu0 %v338_v0 }
  0x3c   :  { %233 = vmatpush3.bf16.msra.mxu0 %v254_v6 }
  0x3d   :  { %234 = vmatprep.subr.bf16.mxu0 %v338_v0 }
  0x40   :  { %235 = vmatpush3.bf16.msra.mxu0 %v255_v7 }
  0x41   :  { %236 = vmatprep.subr.bf16.mxu0 %v338_v0 }
  0x44   :  { %237 = vmatpush3.bf16.msra.mxu0 %v256_v8 }
  0x47   :  { %239 = vmatmul.mubr.bf16.vlgmr.msra.gmra.mrb[0].mxu0 %v257_v9 }
 0x11a   :  { %v157_v11 = vpop.f32.mrb[0].mxu0 }
 0x11b   :  { %v158_v12 = vadd.f32 %v194_v10, %v157_v11  ;;  %v240_v13 = vpop.f32.mrb[1].mxu0 }
 0x11c   :  { %v160_v14 = vpop.f32.mrb[2].mxu0 }
 0x11d   :  { %v161_v15 = vadd.f32 %v194_v10, %v160_v14  ;;  %v241_v16 = vpop.f32.mrb[3].mxu0  ;;  %258 = vtanh.f32 %v158_v12 }
 0x11f   :  { %260 = vtanh.f32 %v161_v15 }
 0x127   :  { %v259_v17 = vpop.eup %258 }
 0x129   :  { %v261_v18 = vpop.eup %260 }
 0x12a   :  { %v211_v19 = vpack.c.bf16 %v261_v18, %v259_v17 }
 0x12c   :  { %212 = vst [vmem:[#allocation7] sm:$0xff] %v211_v19  }
 0x12d   :  { %317 = shalt.err (!%p314_p6)
}
 0x12e   :  { %s318_s15 = scalar_lea.hbm %s412_s3, 128 }
 0x12f   :  { %p319_p7 = scmp.ne.s32.totalorder %s412_s3, %s318_s15  ;;  %p322_p8 = scmp.lt.u32.totalorder %s318_s15, %s412_s3 }
 0x131   :  { %p324_p9 = pnand %p322_p8, %p319_p7 }
 0x133   :  { %327 = shalt.err (!%p324_p9)
}
 0x134   :  { %187 = dma.vmem_to_hbm [thread:$0]  %s182_s12, 128, %s412_s3, [#allocation4], %s335_s22, %s335_s22, %s336_s23  }
 0x135   :  { %332 = dma.done.wait [#allocation4], 128  }
 0x136   :  { %333 = vsyncadd [#allocation4], 4294967168 }
 0x137   :  { %191 = vsyncpa [#allocation3], 1 }
 0x138   :  { %192 = vsyncpa [#allocation6], 1 }
 0x139   :  { %193 = vsyncpa [#allocation4], 1 }

</bundles_post_ra>
